<compile_context>
chip_gen: v7x
topology: tpu7x:2x2x1
jax: 0.10.0
libtpu: 0.0.40
codegen_flags: <defaults>
</compile_context>

<pallas_src>
import jax
import jax.numpy as jnp
from jax import lax
from jax.experimental import pallas as pl
from jax.experimental.pallas import tpu as pltpu


# ----------------------------- Pallas kernel -----------------------------

def _make_kernel(hw_valid, hw_pad, tile_hw, use_mxu_epilogue):
    """Build the fused GlobalContext kernel.

    Grid = (batch_groups, spatial_tiles). Per grid step we see one
    (B_TILE, C, T) slab of x (lane-dense: HW on lanes, C on sublanes).
    Online softmax over the spatial axis; MLP epilogue on the last tile.
    """
    need_mask = (hw_pad != hw_valid)   # static: padded spatial lanes present?

    def kernel(x_ref, k_ref, kb_ref, w1_ref, b1_ref, w2_ref, b2_ref,
               o_ref, m_sc, d_sc, acc_sc):
        t = pl.program_id(1)

        @pl.when(t == 0)
        def _():
            m_sc[...] = jnp.full(m_sc.shape, -jnp.inf, jnp.float32)
            d_sc[...] = jnp.zeros(d_sc.shape, jnp.float32)
            acc_sc[...] = jnp.zeros(acc_sc.shape, jnp.float32)

        x = x_ref[...].astype(jnp.float32)                 # (BT, C, T), lane-dense
        k = k_ref[...].astype(jnp.float32)[None]           # (1, C, 1)

        # to_k 1x1 conv: context logits for this spatial tile -> (BT, 1, T).
        # (bias cancels in softmax but is kept for fidelity.)
        logits = (jnp.sum(x * k, axis=1, keepdims=True)
                  + kb_ref[...].astype(jnp.float32))

        if need_mask:
            # Padded spatial lanes (zero-filled in the wrapper) get -inf logits
            # so they contribute exactly zero softmax mass.
            pos = t * tile_hw + lax.broadcasted_iota(jnp.int32, (1, 1, tile_hw), 2)
            logits = jnp.where(pos < hw_valid, logits, -jnp.inf)

        # Online softmax update (flash-attention style), f32 accumulation.
        m_prev = m_sc[...]                                                  # (BT,1,1)
        m_new = jnp.maximum(m_prev, jnp.max(logits, axis=2, keepdims=True))
        alpha = jnp.exp(m_prev - m_new)                                     # (BT,1,1)
        p = jnp.exp(logits - m_new)                                         # (BT,1,T)

        d_sc[...] = alpha * d_sc[...] + jnp.sum(p, axis=2, keepdims=True)
        acc_sc[...] = alpha * acc_sc[...] + jnp.sum(x * p, axis=2, keepdims=True)
        m_sc[...] = m_new

        @pl.when(t == pl.num_programs(1) - 1)
        def _():
            # pooled[b, c] = sum_n softmax(context)[b, n] * x[b, c, n]
            pooled = (acc_sc[...] / d_sc[...])[:, :, 0]                     # (BT, C)
            w1 = w1_ref[...].astype(jnp.float32)                            # (C, hid)
            b1 = b1_ref[...].astype(jnp.float32)                            # (1, hid)
            w2 = w2_ref[...].astype(jnp.float32)                            # (hid, Co)
            b2 = b2_ref[...].astype(jnp.float32)                            # (1, Co)

            # net: Conv1x1 -> SiLU -> Conv1x1 -> Sigmoid (once per batch group).
            if use_mxu_epilogue:
                # MXU is completely idle in this kernel -> thin matmuls are free.
                h = jnp.dot(pooled, w1, preferred_element_type=jnp.float32) + b1
            else:
                h = jnp.sum(pooled[:, :, None] * w1[None], axis=1) + b1
            h = h * jax.nn.sigmoid(h)                                       # SiLU
            if use_mxu_epilogue:
                o = jnp.dot(h, w2, preferred_element_type=jnp.float32) + b2
            else:
                o = jnp.sum(h[:, :, None] * w2[None], axis=1) + b2
            # Lane-dense store: (BT, 1, C_out) with C_out on the lane axis.
            o_ref[...] = jax.nn.sigmoid(o)[:, None, :].astype(o_ref.dtype)

    return kernel


# ----------------------------- wrapper -----------------------------

def _choose_tiles(batch, channels, hw_pad, itemsize, max_tile_hw, target_slab_bytes):
    """Pick (B_TILE, T): B_TILE divides batch, T is a multiple of 128 dividing
    hw_pad, and the input slab B_TILE*C*T*itemsize stays under target."""
    t_cap = min(hw_pad, max(128, (max_tile_hw // 128) * 128))
    bt_candidates = [d for d in range(min(batch, 8), 0, -1) if batch % d == 0]
    for bt in bt_candidates:
        for cand in range(t_cap, 127, -128):
            if hw_pad % cand == 0 and bt * channels * cand * itemsize <= target_slab_bytes:
                return bt, cand
    # hw_pad is always a multiple of 128, so T=128 is a valid last resort.
    return 1, 128


def global_context(x_nchw, params, *, max_tile_hw=2048, target_slab_bytes=4 << 20):
    """x_nchw: (B, C_in, H, W) -> (B, C_out, 1, 1), matching the PyTorch module.

    x may be f32 or bf16 (bf16 recommended: halves HBM traffic; the kernel
    accumulates in f32 either way).
    """
    B, C, H, W = x_nchw.shape
    HW = H * W
    hid = params['w1'].shape[1]
    c_out = params['w2'].shape[1]

    x = x_nchw.reshape(B, C, HW)             # contiguous reshape, no data movement
    hw_pad = ((HW + 127) // 128) * 128
    if hw_pad != HW:
        # Padded lanes are masked to -inf inside the kernel (zero softmax mass).
        x = jnp.pad(x, ((0, 0), (0, 0), (0, hw_pad - HW)))

    itemsize = jnp.dtype(x.dtype).itemsize
    bt, T = _choose_tiles(B, C, hw_pad, itemsize, max_tile_hw, target_slab_bytes)
    n_t = hw_pad // T

    use_mxu_epilogue = (C >= 128 and hid >= 8)
    kernel = _make_kernel(HW, hw_pad, T, use_mxu_epilogue)

    # Explicit VMEM budget: x slab is double-buffered; v5e's scoped default is
    # only 16 MiB, so state the requirement (with headroom) explicitly.
    slab = bt * C * T * itemsize
    weight_bytes = sum(int(p.size) * jnp.dtype(p.dtype).itemsize for p in params.values())
    vmem_limit = int(min(64 << 20, max(16 << 20, 4 * slab + 4 * weight_bytes + (2 << 20))))

    out = pl.pallas_call(
        kernel,
        out_shape=jax.ShapeDtypeStruct((B, 1, c_out), jnp.float32),
        grid=(B // bt, n_t),
        in_specs=[
            pl.BlockSpec((bt, C, T), lambda b, t: (b, 0, t)),     # x slab (lane-dense)
            pl.BlockSpec((C, 1), lambda b, t: (0, 0)),            # to_k weight
            pl.BlockSpec((1, 1), lambda b, t: (0, 0)),            # to_k bias
            pl.BlockSpec((C, hid), lambda b, t: (0, 0)),          # net conv1 W (C_in, hid)
            pl.BlockSpec((1, hid), lambda b, t: (0, 0)),          # net conv1 b
            pl.BlockSpec((hid, c_out), lambda b, t: (0, 0)),      # net conv2 W (hid, C_out)
            pl.BlockSpec((1, c_out), lambda b, t: (0, 0)),        # net conv2 b
        ],
        out_specs=pl.BlockSpec((bt, 1, c_out), lambda b, t: (b, 0, 0)),
        scratch_shapes=[
            pltpu.VMEM((bt, 1, 1), jnp.float32),    # running max m
            pltpu.VMEM((bt, 1, 1), jnp.float32),    # running denom
            pltpu.VMEM((bt, C, 1), jnp.float32),    # running weighted sum
        ],
        compiler_params=pltpu.CompilerParams(
            dimension_semantics=("parallel", "arbitrary"),
            vmem_limit_bytes=vmem_limit),
    )(x, params['k'], params['kb'], params['w1'], params['b1'],
      params['w2'], params['b2'])

    # (B, 1, C_out) -> (B, C_out, 1, 1): pure reshape, same element order.
    return out.reshape(B, c_out, 1, 1)


# ----------------------------- pure-JAX reference -----------------------------

def global_context_ref(x_nchw, params):
    B, C, H, W = x_nchw.shape
    xf = x_nchw.reshape(B, C, H * W).astype(jnp.float32)
    logits = (jnp.einsum('bcn,c->bn', xf, params['k'][:, 0].astype(jnp.float32))
              + params['kb'][0, 0])
    attn = jax.nn.softmax(logits, axis=-1)                  # (B, HW)
    pooled = jnp.einsum('bn,bcn->bc', attn, xf)             # (B, C)
    h = pooled @ params['w1'] + params['b1'][0]
    h = h * jax.nn.sigmoid(h)
    o = h @ params['w2'] + params['b2'][0]
    return jax.nn.sigmoid(o)                                # (B, C_out)


# ----------------------------- deterministic demo -----------------------------

def make_params(key, c_in, c_out):
    hidden = max(3, c_out // 2)
    ks = jax.random.split(key, 6)
    return {
        # to_k: Conv2d(c_in, 1, 1)  -> weight (c_in, 1), bias (1, 1)
        'k': jax.random.normal(ks[0], (c_in, 1), jnp.float32) / jnp.sqrt(c_in),
        'kb': 0.01 * jax.random.normal(ks[1], (1, 1), jnp.float32),
        # net[0]: Conv2d(c_in, hidden, 1)  -> weight stored as (c_in, hidden)
        'w1': jax.random.normal(ks[2], (c_in, hidden), jnp.float32) / jnp.sqrt(c_in),
        'b1': 0.01 * jax.random.normal(ks[3], (1, hidden), jnp.float32),
        # net[2]: Conv2d(hidden, c_out, 1) -> weight stored as (hidden, c_out)
        'w2': jax.random.normal(ks[4], (hidden, c_out), jnp.float32) / jnp.sqrt(hidden),
        'b2': 0.01 * jax.random.normal(ks[5], (1, c_out), jnp.float32),
    }


if __name__ == "__main__":
    key = jax.random.PRNGKey(0)

    configs = [
        # (B, C_in, C_out, H, W, max_tile_hw)
        (2, 8, 8, 16, 16, 128),     # multi-tile online softmax (HW=256 -> 2 tiles)
        (2, 8, 8, 15, 15, 2048),    # HW=225 -> padded to 256, masked tail lanes
        (2, 128, 128, 8, 8, 2048),  # MXU MLP-epilogue path (C >= 128)
    ]

    for i, (B, C_IN, C_OUT, H, W, mt) in enumerate(configs):
        k_x, k_p, key = jax.random.split(key, 3)
        x = jax.random.normal(k_x, (B, C_IN, H, W), jnp.float32)   # NCHW, PyTorch convention
        params = make_params(k_p, C_IN, C_OUT)

        # bf16 input halves HBM traffic; the kernel casts to f32 and accumulates
        # in f32, so precision loss is only in x's representation itself.
        x_bf16 = x.astype(jnp.bfloat16)

        out = global_context(x_bf16, params, max_tile_hw=mt)
        jax.block_until_ready(out)
        assert out.shape == (B, C_OUT, 1, 1), out.shape

        # Reference operates on the same bf16-rounded input (f32 math), so only
        # accumulation-order / MXU-pass differences remain -> loose-ish tolerance.
        ref = global_context_ref(x_bf16, params)
        assert jnp.allclose(out.reshape(B, C_OUT), ref, atol=1e-2, rtol=1e-2), (
            f"config {i}: mismatch vs pure-JAX reference")

    print("KERNEL_OK")
</pallas_src>

<mosaic_0001>
module attributes {stable_mosaic.version = 11 : i64} {
  func.func @kernel(%arg0: i32, %arg1: i32, %arg2: memref<2x8x128xbf16, #tpu.memory_space<vmem>>, %arg3: memref<8x1xf32, #tpu.memory_space<vmem>>, %arg4: memref<1x1xf32, #tpu.memory_space<vmem>>, %arg5: memref<8x4xf32, #tpu.memory_space<vmem>>, %arg6: memref<1x4xf32, #tpu.memory_space<vmem>>, %arg7: memref<4x8xf32, #tpu.memory_space<vmem>>, %arg8: memref<1x8xf32, #tpu.memory_space<vmem>>, %arg9: memref<2x1x8xf32, #tpu.memory_space<vmem>>, %arg10: memref<2x1x1xf32, #tpu.memory_space<vmem>>, %arg11: memref<2x1x1xf32, #tpu.memory_space<vmem>>, %arg12: memref<2x8x1xf32, #tpu.memory_space<vmem>>) attributes {dimension_semantics = [#tpu.dimension_semantics<parallel>, #tpu.dimension_semantics<arbitrary>], iteration_bounds = array<i64: 1, 2>, scalar_prefetch = 0 : i64, scratch_operands = 3 : i64, tpu.core_type = #tpu.core_type<tc>, window_params = [{transform_indices = @transform_0, window_bounds = array<i64: 2, 8, 128>}, {pipeline_mode = #tpu.pipeline_mode<synchronous>, transform_indices = @transform_1, window_bounds = array<i64: 8, 1>}, {pipeline_mode = #tpu.pipeline_mode<synchronous>, transform_indices = @transform_2, window_bounds = array<i64: 1, 1>}, {pipeline_mode = #tpu.pipeline_mode<synchronous>, transform_indices = @transform_3, window_bounds = array<i64: 8, 4>}, {pipeline_mode = #tpu.pipeline_mode<synchronous>, transform_indices = @transform_4, window_bounds = array<i64: 1, 4>}, {pipeline_mode = #tpu.pipeline_mode<synchronous>, transform_indices = @transform_5, window_bounds = array<i64: 4, 8>}, {pipeline_mode = #tpu.pipeline_mode<synchronous>, transform_indices = @transform_6, window_bounds = array<i64: 1, 8>}, {transform_indices = @transform_7, window_bounds = array<i64: 2, 1, 8>}]} {
    %c0_i32 = arith.constant 0 : i32
    %0 = arith.cmpi eq, %arg1, %c0_i32 : i32
    %1 = arith.extui %0 : i1 to i32
    %c0_i32_0 = arith.constant 0 : i32
    %2 = arith.cmpi ne, %1, %c0_i32_0 : i32
    scf.if %2 {
      %cst_29 = arith.constant 0xFF800000 : f32
      %43 = vector.broadcast %cst_29 : f32 to vector<2x1x1xf32>
      %c0_30 = arith.constant 0 : index
      %c0_31 = arith.constant 0 : index
      %c0_32 = arith.constant 0 : index
      %44 = vector.load %arg10[%c0_30, %c0_31, %c0_32] : memref<2x1x1xf32, #tpu.memory_space<vmem>>, vector<2x1x1xf32>
      tpu.vector_store %arg10[%c0_30, %c0_31, %c0_32], %43 {strides = array<i32>} : memref<2x1x1xf32, #tpu.memory_space<vmem>>, vector<2x1x1xf32>,
      %cst_33 = arith.constant 0.000000e+00 : f32
      %45 = vector.broadcast %cst_33 : f32 to vector<2x1x1xf32>
      %c0_34 = arith.constant 0 : index
      %c0_35 = arith.constant 0 : index
      %c0_36 = arith.constant 0 : index
      %46 = vector.load %arg11[%c0_34, %c0_35, %c0_36] : memref<2x1x1xf32, #tpu.memory_space<vmem>>, vector<2x1x1xf32>
      tpu.vector_store %arg11[%c0_34, %c0_35, %c0_36], %45 {strides = array<i32>} : memref<2x1x1xf32, #tpu.memory_space<vmem>>, vector<2x1x1xf32>,
      %cst_37 = arith.constant 0.000000e+00 : f32
      %47 = vector.broadcast %cst_37 : f32 to vector<2x8x1xf32>
      %c0_38 = arith.constant 0 : index
      %c0_39 = arith.constant 0 : index
      %c0_40 = arith.constant 0 : index
      %48 = vector.load %arg12[%c0_38, %c0_39, %c0_40] : memref<2x8x1xf32, #tpu.memory_space<vmem>>, vector<2x8x1xf32>
      tpu.vector_store %arg12[%c0_38, %c0_39, %c0_40], %47 {strides = array<i32>} : memref<2x8x1xf32, #tpu.memory_space<vmem>>, vector<2x8x1xf32>,
    } else {
    }
    %c0 = arith.constant 0 : index
    %c0_1 = arith.constant 0 : index
    %c0_2 = arith.constant 0 : index
    %3 = vector.load %arg2[%c0, %c0_1, %c0_2] : memref<2x8x128xbf16, #tpu.memory_space<vmem>>, vector<2x8x128xbf16>
    %4 = arith.extf %3 : vector<2x8x128xbf16> to vector<2x8x128xf32>
    %c0_3 = arith.constant 0 : index
    %c0_4 = arith.constant 0 : index
    %5 = vector.load %arg3[%c0_3, %c0_4] : memref<8x1xf32, #tpu.memory_space<vmem>>, vector<8x1xf32>
    %6 = vector.shape_cast %5 : vector<8x1xf32> to vector<1x8x1xf32>
    %7 = vector.broadcast %6 : vector<1x8x1xf32> to vector<2x8x128xf32>
    %8 = arith.mulf %4, %7 : vector<2x8x128xf32>
    %cst = arith.constant dense<0.000000e+00> : vector<2x128xf32>
    %9 = vector.multi_reduction <add>, %8, %cst [1] : vector<2x8x128xf32> to vector<2x128xf32>
    %10 = vector.shape_cast %9 : vector<2x128xf32> to vector<2x1x128xf32>
    %c0_5 = arith.constant 0 : index
    %c0_6 = arith.constant 0 : index
    %11 = vector.load %arg4[%c0_5, %c0_6] : memref<1x1xf32, #tpu.memory_space<vmem>>, vector<1x1xf32>
    %12 = vector.shape_cast %11 : vector<1x1xf32> to vector<1x1x1xf32>
    %13 = vector.broadcast %12 : vector<1x1x1xf32> to vector<2x1x128xf32>
    %14 = arith.addf %10, %13 : vector<2x1x128xf32>
    %c0_7 = arith.constant 0 : index
    %c0_8 = arith.constant 0 : index
    %c0_9 = arith.constant 0 : index
    %15 = vector.load %arg10[%c0_7, %c0_8, %c0_9] : memref<2x1x1xf32, #tpu.memory_space<vmem>>, vector<2x1x1xf32>
    %cst_10 = arith.constant dense<0xFF800000> : vector<2x1xf32>
    %16 = vector.multi_reduction <maximumf>, %14, %cst_10 [2] : vector<2x1x128xf32> to vector<2x1xf32>
    %17 = vector.shape_cast %16 : vector<2x1xf32> to vector<2x1x1xf32>
    %18 = arith.maximumf %15, %17 : vector<2x1x1xf32>
    %19 = arith.subf %15, %18 : vector<2x1x1xf32>
    %20 = math.exp %19 : vector<2x1x1xf32>
    %21 = vector.broadcast %18 : vector<2x1x1xf32> to vector<2x1x128xf32>
    %22 = arith.subf %14, %21 : vector<2x1x128xf32>
    %23 = math.exp %22 : vector<2x1x128xf32>
    %c0_11 = arith.constant 0 : index
    %c0_12 = arith.constant 0 : index
    %c0_13 = arith.constant 0 : index
    %24 = vector.load %arg11[%c0_11, %c0_12, %c0_13] : memref<2x1x1xf32, #tpu.memory_space<vmem>>, vector<2x1x1xf32>
    %25 = arith.mulf %20, %24 : vector<2x1x1xf32>
    %cst_14 = arith.constant dense<0.000000e+00> : vector<2x1xf32>
    %26 = vector.multi_reduction <add>, %23, %cst_14 [2] : vector<2x1x128xf32> to vector<2x1xf32>
    %27 = vector.shape_cast %26 : vector<2x1xf32> to vector<2x1x1xf32>
    %28 = arith.addf %25, %27 : vector<2x1x1xf32>
    %c0_15 = arith.constant 0 : index
    %c0_16 = arith.constant 0 : index
    %c0_17 = arith.constant 0 : index
    %29 = vector.load %arg11[%c0_15, %c0_16, %c0_17] : memref<2x1x1xf32, #tpu.memory_space<vmem>>, vector<2x1x1xf32>
    tpu.vector_store %arg11[%c0_15, %c0_16, %c0_17], %28 {strides = array<i32>} : memref<2x1x1xf32, #tpu.memory_space<vmem>>, vector<2x1x1xf32>,
    %c0_18 = arith.constant 0 : index
    %c0_19 = arith.constant 0 : index
    %c0_20 = arith.constant 0 : index
    %30 = vector.load %arg12[%c0_18, %c0_19, %c0_20] : memref<2x8x1xf32, #tpu.memory_space<vmem>>, vector<2x8x1xf32>
    %31 = vector.broadcast %20 : vector<2x1x1xf32> to vector<2x8x1xf32>
    %32 = arith.mulf %31, %30 : vector<2x8x1xf32>
    %33 = vector.broadcast %23 : vector<2x1x128xf32> to vector<2x8x128xf32>
    %34 = arith.mulf %4, %33 : vector<2x8x128xf32>
    %cst_21 = arith.constant dense<0.000000e+00> : vector<2x8xf32>
    %35 = vector.multi_reduction <add>, %34, %cst_21 [2] : vector<2x8x128xf32> to vector<2x8xf32>
    %36 = vector.shape_cast %35 : vector<2x8xf32> to vector<2x8x1xf32>
    %37 = arith.addf %32, %36 : vector<2x8x1xf32>
    %c0_22 = arith.constant 0 : index
    %c0_23 = arith.constant 0 : index
    %c0_24 = arith.constant 0 : index
    %38 = vector.load %arg12[%c0_22, %c0_23, %c0_24] : memref<2x8x1xf32, #tpu.memory_space<vmem>>, vector<2x8x1xf32>
    tpu.vector_store %arg12[%c0_22, %c0_23, %c0_24], %37 {strides = array<i32>} : memref<2x8x1xf32, #tpu.memory_space<vmem>>, vector<2x8x1xf32>,
    %c0_25 = arith.constant 0 : index
    %c0_26 = arith.constant 0 : index
    %c0_27 = arith.constant 0 : index
    %39 = vector.load %arg10[%c0_25, %c0_26, %c0_27] : memref<2x1x1xf32, #tpu.memory_space<vmem>>, vector<2x1x1xf32>
    tpu.vector_store %arg10[%c0_25, %c0_26, %c0_27], %18 {strides = array<i32>} : memref<2x1x1xf32, #tpu.memory_space<vmem>>, vector<2x1x1xf32>,
    %c1_i32 = arith.constant 1 : i32
    %40 = arith.cmpi eq, %arg1, %c1_i32 : i32
    %41 = arith.extui %40 : i1 to i32
    %c0_i32_28 = arith.constant 0 : i32
    %42 = arith.cmpi ne, %41, %c0_i32_28 : i32
    scf.if %42 {
      %c0_29 = arith.constant 0 : index
      %c0_30 = arith.constant 0 : index
      %c0_31 = arith.constant 0 : index
      %43 = vector.load %arg12[%c0_29, %c0_30, %c0_31] : memref<2x8x1xf32, #tpu.memory_space<vmem>>, vector<2x8x1xf32>
      %c0_32 = arith.constant 0 : index
      %c0_33 = arith.constant 0 : index
      %c0_34 = arith.constant 0 : index
      %44 = vector.load %arg11[%c0_32, %c0_33, %c0_34] : memref<2x1x1xf32, #tpu.memory_space<vmem>>, vector<2x1x1xf32>
      %45 = vector.broadcast %44 : vector<2x1x1xf32> to vector<2x8x1xf32>
      %46 = arith.divf %43, %45 : vector<2x8x1xf32>
      %47 = vector.shape_cast %46 : vector<2x8x1xf32> to vector<2x8xf32>
      %c0_35 = arith.constant 0 : index
      %c0_36 = arith.constant 0 : index
      %48 = vector.load %arg5[%c0_35, %c0_36] : memref<8x4xf32, #tpu.memory_space<vmem>>, vector<8x4xf32>
      %c0_37 = arith.constant 0 : index
      %c0_38 = arith.constant 0 : index
      %49 = vector.load %arg6[%c0_37, %c0_38] : memref<1x4xf32, #tpu.memory_space<vmem>>, vector<1x4xf32>
      %c0_39 = arith.constant 0 : index
      %c0_40 = arith.constant 0 : index
      %50 = vector.load %arg7[%c0_39, %c0_40] : memref<4x8xf32, #tpu.memory_space<vmem>>, vector<4x8xf32>
      %c0_41 = arith.constant 0 : index
      %c0_42 = arith.constant 0 : index
      %51 = vector.load %arg8[%c0_41, %c0_42] : memref<1x8xf32, #tpu.memory_space<vmem>>, vector<1x8xf32>
      %52 = vector.shape_cast %47 : vector<2x8xf32> to vector<2x8x1xf32>
      %53 = vector.shape_cast %48 : vector<8x4xf32> to vector<1x8x4xf32>
      %54 = vector.broadcast %52 : vector<2x8x1xf32> to vector<2x8x4xf32>
      %55 = vector.broadcast %53 : vector<1x8x4xf32> to vector<2x8x4xf32>
      %56 = arith.mulf %54, %55 : vector<2x8x4xf32>
      %cst_43 = arith.constant dense<0.000000e+00> : vector<2x4xf32>
      %57 = vector.multi_reduction <add>, %56, %cst_43 [1] : vector<2x8x4xf32> to vector<2x4xf32>
      %58 = vector.broadcast %49 : vector<1x4xf32> to vector<2x4xf32>
      %59 = arith.addf %57, %58 : vector<2x4xf32>
      %60 = arith.negf %59 : vector<2x4xf32>
      %61 = math.exp %60 : vector<2x4xf32>
      %cst_44 = arith.constant 1.000000e+00 : f32
      %62 = vector.broadcast %cst_44 : f32 to vector<2x4xf32>
      %63 = arith.addf %62, %61 : vector<2x4xf32>
      %64 = arith.divf %62, %63 : vector<2x4xf32>
      %65 = arith.mulf %59, %64 : vector<2x4xf32>
      %66 = vector.shape_cast %65 : vector<2x4xf32> to vector<2x4x1xf32>
      %67 = vector.shape_cast %50 : vector<4x8xf32> to vector<1x4x8xf32>
      %68 = vector.broadcast %66 : vector<2x4x1xf32> to vector<2x4x8xf32>
      %69 = vector.broadcast %67 : vector<1x4x8xf32> to vector<2x4x8xf32>
      %70 = arith.mulf %68, %69 : vector<2x4x8xf32>
      %cst_45 = arith.constant dense<0.000000e+00> : vector<2x8xf32>
      %71 = vector.multi_reduction <add>, %70, %cst_45 [1] : vector<2x4x8xf32> to vector<2x8xf32>
      %72 = vector.broadcast %51 : vector<1x8xf32> to vector<2x8xf32>
      %73 = arith.addf %71, %72 : vector<2x8xf32>
      %74 = arith.negf %73 : vector<2x8xf32>
      %75 = math.exp %74 : vector<2x8xf32>
      %cst_46 = arith.constant 1.000000e+00 : f32
      %76 = vector.broadcast %cst_46 : f32 to vector<2x8xf32>
      %77 = arith.addf %76, %75 : vector<2x8xf32>
      %78 = arith.divf %76, %77 : vector<2x8xf32>
      %79 = vector.shape_cast %78 : vector<2x8xf32> to vector<2x1x8xf32>
      %c0_47 = arith.constant 0 : index
      %c0_48 = arith.constant 0 : index
      %c0_49 = arith.constant 0 : index
      %80 = vector.load %arg9[%c0_47, %c0_48, %c0_49] : memref<2x1x8xf32, #tpu.memory_space<vmem>>, vector<2x1x8xf32>
      tpu.vector_store %arg9[%c0_47, %c0_48, %c0_49], %79 {strides = array<i32>} : memref<2x1x8xf32, #tpu.memory_space<vmem>>, vector<2x1x8xf32>,
    } else {
    }
    return
  }
  func.func @transform_0(%arg0: i32, %arg1: i32) -> (i32, i32, i32) {
    %c0_i32 = arith.constant 0 : i32
    %c0_i32_0 = arith.constant 0 : i32
    return %arg0, %c0_i32, %arg1 : i32, i32, i32
  }
  func.func @transform_1(%arg0: i32, %arg1: i32) -> (i32, i32) {
    %c0_i32 = arith.constant 0 : i32
    %c0_i32_0 = arith.constant 0 : i32
    %c0_i32_1 = arith.constant 0 : i32
    return %c0_i32, %c0_i32_0 : i32, i32
  }
  func.func @transform_2(%arg0: i32, %arg1: i32) -> (i32, i32) {
    %c0_i32 = arith.constant 0 : i32
    %c0_i32_0 = arith.constant 0 : i32
    %c0_i32_1 = arith.constant 0 : i32
    return %c0_i32, %c0_i32_0 : i32, i32
  }
  func.func @transform_3(%arg0: i32, %arg1: i32) -> (i32, i32) {
    %c0_i32 = arith.constant 0 : i32
    %c0_i32_0 = arith.constant 0 : i32
    %c0_i32_1 = arith.constant 0 : i32
    return %c0_i32, %c0_i32_0 : i32, i32
  }
  func.func @transform_4(%arg0: i32, %arg1: i32) -> (i32, i32) {
    %c0_i32 = arith.constant 0 : i32
    %c0_i32_0 = arith.constant 0 : i32
    %c0_i32_1 = arith.constant 0 : i32
    return %c0_i32, %c0_i32_0 : i32, i32
  }
  func.func @transform_5(%arg0: i32, %arg1: i32) -> (i32, i32) {
    %c0_i32 = arith.constant 0 : i32
    %c0_i32_0 = arith.constant 0 : i32
    %c0_i32_1 = arith.constant 0 : i32
    return %c0_i32, %c0_i32_0 : i32, i32
  }
  func.func @transform_6(%arg0: i32, %arg1: i32) -> (i32, i32) {
    %c0_i32 = arith.constant 0 : i32
    %c0_i32_0 = arith.constant 0 : i32
    %c0_i32_1 = arith.constant 0 : i32
    return %c0_i32, %c0_i32_0 : i32, i32
  }
  func.func @transform_7(%arg0: i32, %arg1: i32) -> (i32, i32, i32) {
    %c0_i32 = arith.constant 0 : i32
    %c0_i32_0 = arith.constant 0 : i32
    %c0_i32_1 = arith.constant 0 : i32
    return %arg0, %c0_i32, %c0_i32_0 : i32, i32, i32
  }
}

</mosaic_0001>

<bundles_post_ra>
// kernel: tpu_custom_call.1
= control target key start
LH: loop header
LB: loop body
LE: loop exit
PB: predicated region body
PF: predicated region fallthrough
CT: control target
= control target key end

     0   :  { %s1014_s0 = inlined_call_operand.vmem [shape: bf16[2,8,256], index: 0, kind: input, shape index: {}]   ;;  %s1015_s1 = inlined_call_operand.vmem [shape: f32[8,1], index: 1, kind: input, shape index: {}]   ;;  %s1016_s2 = inlined_call_operand.<no memory space> [shape: f32[1,1], index: 2, kind: input, shape index: {}]   ;;  %s1017_s3 = inlined_call_operand.vmem [shape: f32[8,4], index: 3, kind: input, shape index: {}]   ;;  %s1018_s4 = inlined_call_operand.vmem [shape: f32[1,4], index: 4, kind: input, shape index: {}]   ;;  %s1019_s5 = inlined_call_operand.vmem [shape: f32[4,8], index: 5, kind: input, shape index: {}]   ;;  %s1020_s6 = inlined_call_operand.vmem [shape: f32[1,8], index: 6, kind: input, shape index: {}]   ;;  %s1021_s7 = inlined_call_operand.hbm [shape: f32[2,1,8], index: 7, kind: output, shape index: {}]  }
   0x1   :  { %v12_v0 = vstv %s1016_s2 }
   0x2   :  { %13 = vst [vmem:[#allocation5] sm:$0x1] %v12_v0 }
   0x3   :  { %14 = vsyncpa [#allocation8], 0  ;;  %s894_s26 = smov 0   ;;  %s896_s27 = smov 0  }
   0x4   :  { %s898_s28 = smov 0   ;;  %s900_s29 = smov 0  }
   0x5   :  { %s902_s30 = smov 0  }
   0x6 LB: > { %s665_s2 = sadd.s32 4294967295, %s842_s30   ;;  %s29_s8 = sadd.s32 1, %s838_s29  ;;  %s842_s30 = sphi %s902_s30, %s20_s30   ;;  %s838_s29 = sphi %s900_s29, %s1026_s29   ;;  %s834_s28 = sphi %s898_s28, %s1025_s28   ;;  %s830_s27 = sphi %s896_s27, %s1024_s27   ;;  %s826_s26 = sphi %s894_s26, %s1023_s26  }
   0x7   : > { %p30_p0 = scmp.ge.s32.totalorder %s29_s8, 2  ;;  %p48_p1 = scmp.ne.s32.totalorder %s830_s27, %s826_s26 }
   0x8   : > { %p49_p2 = scmp.eq.s32.totalorder %s842_s30, 0  ;;  %s41_s10 = sadd.s32 1, %s830_s27 }
   0x9   : > { %s1028_s8 = smov (%p30_p0, %s29_s8), 0  ;;  %p667_p5 = scmp.ge.s32.totalorder %s842_s30, 2 }
   0xa   : > { %p50_p3 = por %p49_p2, %p48_p1  ;;  %s37_s9 = ssub.s32 %s838_s29, %s1028_s8 }
   0xb   : > { %p39_p4 = scmp.eq.s32.totalorder %s37_s9, 0  ;;  %244 = sbr.rel (%p667_p5) target bundleno = 25 (0x19), region = 40 }
   0xd   : > { %s930_s11 = scalar_select %p39_p4, %s830_s27, %s41_s10  }
  0x12   : > { %247 = sbr.rel (!%p50_p3) target bundleno = 25 (0x19), region = 44  ;;  %s249_s12 = sand.u32 (%p50_p3), 1, %s830_s27  }
  0x13   : > { %s669_s13 = sshll.u32 (%p50_p3), %s838_s29, 2  ;;  %s668_s14 = sshll.u32 (%p50_p3), %s249_s12, 3 }
  0x14   : > { %s256_s17 = scalar_lea.vmem (%p50_p3), %s1014_s0, %s669_s13  ;;  %s251_s18 = scalar_lea.vmem (%p50_p3), [#allocation6], %s668_s14 }
  0x15   : > { %v272_v1 = vld [vmem:[%s256_s17] sm:$0xf] (%p50_p3)  ;;  %v274_v2 = vld [vmem:[%s256_s17 + $0x8] sm:$0xf] (%p50_p3) }
  0x16   : > { %273 = vst [vmem:[%s251_s18] sm:$0xf] (%p50_p3), %v272_v1  ;;  %275 = vst [vmem:[%s251_s18 + $0x4] sm:$0xf] (%p50_p3), %v274_v2 }
  0x19 PF: > { %p670_p6 = scmp.ge.s32.totalorder %s842_s30, 1  ;;  %p301_p7 = scmp.lt.s32.totalorder %s842_s30, 3 }
  0x1b   : > { %p302_p8 = pnand %p670_p6, %p301_p7 }
  0x1c   : > { %s308_s19 = sand.u32 (!%p302_p8), 1, %s826_s26   ;;  %p672_p9 = scmp.ne.s32.totalorder (!%p302_p8), %s834_s28, 0 }
  0x1d   : > { %305 = sbr.rel (%p302_p8) target bundleno = 1008 (0x3f0), region = 85  ;;  %s671_s20 = sshll.u32 (!%p302_p8), %s308_s19, 3 }
  0x1e   : > { %s310_s21 = scalar_lea.vmem (!%p302_p8), [#allocation6], %s671_s20 }
  0x24   : > { %339 = sbr.rel (%p672_p9) target bundleno = 43 (0x2b), region = 93  ;;  %vm340_vm0 = vcmask (!%p672_p9), 0   ;;  %vm345_vm1 = vcmask (!%p672_p9), 7168   ;;  %v844_v3 = vmov (!%p672_p9), -inf   ;;  %v845_v4 = vmov (!%p672_p9), 0.0  }
  0x25   : > { %341 = vst.msk [vmem:[#allocation2] sm:$0x1] (!%p672_p9), %vm340_vm0, %v844_v3  ;;  %342 = vst.msk [vmem:[#allocation2 + $0x1] sm:$0x1] (!%p672_p9), %vm340_vm0, %v844_v3 }
  0x26   : > { %343 = vst.msk [vmem:[#allocation3] sm:$0x1] (!%p672_p9), %vm340_vm0, %v845_v4  ;;  %344 = vst.msk [vmem:[#allocation3 + $0x1] sm:$0x1] (!%p672_p9), %vm340_vm0, %v845_v4 }
  0x27   : > { %346 = vst.msk [vmem:[#allocation4] sm:$0xff] (!%p672_p9), %vm345_vm1, %v845_v4  ;;  %347 = vst.msk [vmem:[#allocation4 + $0x8] sm:$0xff] (!%p672_p9), %vm345_vm1, %v845_v4 }
  0x2b PF: > { %v352_v5 = vld [vmem:[%s1015_s1] sm:$0xff]  ;;  %v846_v6 = vmov 0   ;;  %v372_v7 = vld [vmem:[#allocation5] sm:$0x1]  ;;  %v378_v14 = vlaneseq  ;;  %vm432_vm2 = vcmask 0   ;;  %vm459_vm3 = vcmask 7168  }
  0x2c   : > { %743 = vset.pattern.permute.xlu0 %v846_v6  ;;  %744 = vset.pattern.permute.xlu1 %v846_v6  ;;  %v687_v8 = vld [vmem:[%s310_s21] sm:$0xff]   ;;  %p673_p10 = scmp.ne.s32.totalorder %s834_s28, 1 }
  0x2d   : > { %355 = vperm.xlu0 %743, %v352_v5   ;;  %v688_v9 = vunpack.c.l.bf16 %v687_v8  ;;  %v689_v10 = vunpack.c.h.bf16 %v687_v8  ;;  %v379_v19 = vshrl.u32 %v378_v14, 7  ;;  %v384_v33 = vld [vmem:[#allocation2] sm:$0x1]  ;;  %v385_v36 = vld [vmem:[#allocation2 + $0x1] sm:$0x1]  ;;  %vm504_vm4 = vcmask (!%p673_p10), 31744  }
  0x2e   : > { %v422_v56 = vld [vmem:[#allocation3] sm:$0x1]  ;;  %v435_v61 = vld [vmem:[#allocation4] sm:$0xff]  ;;  %v423_v62 = vld [vmem:[#allocation3 + $0x1] sm:$0x1]  ;;  %vm557_vm5 = vcmask (!%p673_p10), 60416  }
  0x2f   : > { %v945_v22 = vsub.s32 0, %v379_v19  ;;  %v436_v5 = vld [vmem:[#allocation4 + $0x8] sm:$0xff]  ;;  %vm592_vm6 = vcmask (!%p673_p10), 57344  }
  0x31   : > { %375 = vperm.xlu0 %743, %v372_v7  }
  0xac   : > { %v356_v11 = vpop.permute.xlu0 %355 }
  0xad   : > { %v358_v12 = vmul.f32 %v688_v9, %v356_v11  ;;  %v359_v13 = vmul.f32 %v689_v10, %v356_v11 }
  0xaf   : > { %v360_v15 = vrot.slane %v358_v12, 4  ;;  %v366_v16 = vrot.slane %v359_v13, 4 }
  0xb0   : > { %v376_v25 = vpop.permute.xlu0 %375 }
  0xb1   : > { %v361_v17 = vadd.f32 %v360_v15, %v358_v12  ;;  %v367_v18 = vadd.f32 %v366_v16, %v359_v13  ;;  %v381_v28 = vrot.slane %v376_v25, %v945_v22  ;;  %v847_v12 = vmov (!%p673_p10), 0  }
  0xb3   : > { %v362_v20 = vrot.slane %v361_v17, 2  ;;  %v368_v21 = vrot.slane %v367_v18, 2 }
  0xb5   : > { %v363_v23 = vadd.f32 %v362_v20, %v361_v17  ;;  %v369_v24 = vadd.f32 %v368_v21, %v367_v18  ;;  %v488_v20 = vld [vmem:[%s1017_s3] sm:$0xff] (!%p673_p10) }
  0xb7   : > { %v364_v26 = vrot.slane %v363_v23, 1  ;;  %v370_v27 = vrot.slane %v369_v24, 1 }
  0xb9   : > { %v365_v29 = vadd.f32 %v364_v26, %v363_v23  ;;  %v371_v31 = vadd.f32 %v370_v27, %v369_v24 }
  0xbb   : > { %v382_v30 = vadd.f32 %v381_v28, %v365_v29  ;;  %v383_v32 = vadd.f32 %v381_v28, %v371_v31 }
  0xbd   : > { %386 = vmax.xlane.f32.xlu1 %v382_v30 }
  0xc1   : > { %388 = vmax.xlane.f32.xlu1 %v383_v32 }
 0x14a   : > { %v387_v34 = vpop.xlane.xlu1 %386 }
 0x14b   : > { %v390_v35 = vmax.f32 %v384_v33, %v387_v34 }
 0x14d   : > { %v392_v37 = vsub.f32 %v384_v33, %v390_v35  ;;  %462 = vst.msk [vmem:[#allocation2] sm:$0x1] %vm432_vm2, %v390_v35  ;;  %400 = vperm.xlu0 %743, %v390_v35  }
 0x14e   : > { %v389_v38 = vpop.xlane.xlu1 %388 }
 0x14f   : > { %v391_v39 = vmax.f32 %v385_v36, %v389_v38  ;;  %v394_v53 = vmul.f32 1.442695, %v392_v37 }
 0x151   : > { %v393_v40 = vsub.f32 %v385_v36, %v391_v39  ;;  %463 = vst.msk [vmem:[#allocation2 + $0x1] sm:$0x1] %vm432_vm2, %v391_v39  ;;  %409 = vperm.xlu1 %744, %v391_v39   ;;  %753 = vset.pattern.permute.xlu0 (!%p673_p10), %v847_v12  ;;  %v676_v36 = vld [vmem:[%s1018_s4] ss:$0 sm:$0xff] (!%p673_p10) }
 0x153   : > { %v396_v54 = vmul.f32 1.442695, %v393_v40 }
 0x1cc   : > { %v401_v41 = vpop.permute.xlu0 %400 }
 0x1cd   : > { %v406_v42 = vrot.slane %v401_v41, %v945_v22 }
 0x1cf   : > { %v416_v43 = vsub.f32 %v382_v30, %v406_v42 }
 0x1d0   : > { %v410_v44 = vpop.permute.xlu1 %409 }
 0x1d1   : > { %v418_v45 = vmul.f32 1.442695, %v416_v43  ;;  %v415_v46 = vrot.slane %v410_v44, %v945_v22 }
 0x1d3   : > { %745 = vpow2.f32 %v418_v45  ;;  %v417_v47 = vsub.f32 %v383_v32, %v415_v46 }
 0x1d5   : > { %v420_v48 = vmul.f32 1.442695, %v417_v47 }
 0x1d7   : > { %747 = vpow2.f32 %v420_v48 }
 0x1d8   : > { %749 = vpow2.f32 %v394_v53 }
 0x1d9   : > { %751 = vpow2.f32 %v396_v54 }
 0x1dd   : > { %v746_v49 = vpop.eup %745 }
 0x1de   : > { %426 = vadd.xlane.f32.xlu0 %v746_v49  ;;  %v451_v50 = vmul.f32 %v746_v49, %v688_v9 }
 0x1e1   : > { %v748_v51 = vpop.eup %747 }
 0x1e2   : > { %453 = vadd.xlane.f32.xlu0 %v451_v50  ;;  %428 = vadd.xlane.f32.xlu1 %v748_v51  ;;  %v452_v52 = vmul.f32 %v748_v51, %v689_v10  ;;  %v750_v55 = vpop.eup %749 }
 0x1e3   : > { %v424_v57 = vmul.f32 %v750_v55, %v422_v56  ;;  %v442_v58 = vrot.slane %v750_v55, %v945_v22  ;;  %v752_v59 = vpop.eup %751  ;;  %v490_v55 = vld [vmem:[%s1019_s5] sm:$0xf] (!%p673_p10) }
 0x1e4   : > { %v425_v1 = vmul.f32 %v752_v59, %v423_v62  ;;  %v446_v2 = vrot.slane %v752_v59, %v945_v22 }
 0x1e5   : > { %v449_v0 = vmul.f32 %v442_v58, %v435_v61 }
 0x1e6   : > { %455 = vadd.xlane.f32.xlu0 %v452_v52  ;;  %v450_v8 = vmul.f32 %v446_v2, %v436_v5  ;;  %v679_v5 = vld [vmem:[%s1020_s6] ss:$0 sm:$0xff] (!%p673_p10) }
 0x26b   : > { %v427_v60 = vpop.xlane.xlu0 %426 }
 0x26c   : > { %v430_v63 = vadd.f32 %v427_v60, %v424_v57 }
 0x26e   : > { %433 = vst.msk [vmem:[#allocation3] sm:$0x1] %vm432_vm2, %v430_v63 }
 0x26f   : > { %v454_v3 = vpop.xlane.xlu0 %453  ;;  %v429_v4 = vpop.xlane.xlu1 %428 }
 0x270   : > { %v457_v6 = vadd.f32 %v454_v3, %v449_v0  ;;  %v431_v7 = vadd.f32 %v429_v4, %v425_v1  ;;  %467 = sbr.rel (%p673_p10) target bundleno = 982 (0x3d6), region = 97 }
 0x272   : > { %460 = vst.msk [vmem:[#allocation4] sm:$0xff] %vm459_vm3, %v457_v6 }
 0x273   : > { %434 = vst.msk [vmem:[#allocation3 + $0x1] sm:$0x1] %vm432_vm2, %v431_v7  ;;  %v456_v9 = vpop.xlane.xlu0 %455 }
 0x274   : > { %v458_v10 = vadd.f32 %v456_v9, %v450_v8 }
 0x275   : > { %v674_v11 = vld [vmem:[#allocation3] ss:$0 sm:$0xff] (!%p673_p10) }
 0x276   : > { %461 = vst.msk [vmem:[#allocation4 + $0x8] sm:$0xff] %vm459_vm3, %v458_v10  ;;  %754 = vrcp.f32 (!%p673_p10), %v674_v11 }
 0x279   : > { %v468_v14 = vld [vmem:[#allocation4] sm:$0xff] }
 0x27a   : > { %v675_v13 = vld [vmem:[#allocation3 + $0x1] ss:$0 sm:$0xff] }
 0x27b   : > { %756 = vrcp.f32 %v675_v13 }
 0x27d   : > { %v469_v16 = vld [vmem:[#allocation4 + $0x8] sm:$0xff] }
 0x280   : > { %v755_v15 = vpop.eup %754 }
 0x281   : > { %v485_v18 = vmul.f32 %v755_v15, %v468_v14 }
 0x283   : > { %494 = vperm.xlu0 %753, %v485_v18  }
 0x285   : > { %v757_v17 = vpop.eup %756 }
 0x286   : > { %v487_v19 = vmul.f32 %v757_v17, %v469_v16 }
 0x288   : > { %499 = vperm.xlu0 %753, %v487_v19  }
 0x302   : > { %v495_v21 = vpop.permute.xlu0 %494 }
 0x303   : > { %v502_v23 = vmul.f32 %v495_v21, %v488_v20 }
 0x305   : > { %v505_v24 = vsel %vm504_vm4, %v502_v23, 0.0 }
 0x306   : > { %v506_v25 = vrot.slane %v505_v24, 4 }
 0x307   : > { %v500_v26 = vpop.permute.xlu0 %499 }
 0x308   : > { %v503_v27 = vmul.f32 %v500_v26, %v488_v20  ;;  %v507_v28 = vadd.f32 %v506_v25, %v505_v24 }
 0x30a   : > { %v512_v29 = vsel %vm504_vm4, %v503_v27, 0.0  ;;  %v508_v30 = vrot.slane %v507_v28, 2 }
 0x30b   : > { %v513_v31 = vrot.slane %v512_v29, 4 }
 0x30c   : > { %v509_v32 = vadd.f32 %v508_v30, %v507_v28 }
 0x30d   : > { %v514_v33 = vadd.f32 %v513_v31, %v512_v29 }
 0x30e   : > { %v510_v35 = vrot.slane %v509_v32, 1 }
 0x30f   : > { %v515_v34 = vrot.slane %v514_v33, 2 }
 0x310   : > { %v511_v38 = vadd.f32 %v510_v35, %v509_v32 }
 0x311   : > { %v516_v37 = vadd.f32 %v515_v34, %v514_v33 }
 0x312   : > { %v525_v40 = vadd.f32 %v676_v36, %v511_v38 }
 0x313   : > { %v517_v39 = vrot.slane %v516_v37, 1 }
 0x314   : > { %v677_v41 = vmul.f32 -1.442695, %v525_v40 }
 0x315   : > { %v518_v42 = vadd.f32 %v517_v39, %v516_v37 }
 0x316   : > { %758 = vpow2.f32 %v677_v41 }
 0x317   : > { %v526_v43 = vadd.f32 %v676_v36, %v518_v42 }
 0x319   : > { %v678_v44 = vmul.f32 -1.442695, %v526_v43 }
 0x31b   : > { %760 = vpow2.f32 %v678_v44 }
 0x320   : > { %v759_v45 = vpop.eup %758 }
 0x321   : > { %v533_v46 = vadd.f32 1.0, %v759_v45 }
 0x323   : > { %762 = vrcp.f32 %v533_v46 }
 0x325   : > { %v761_v47 = vpop.eup %760 }
 0x326   : > { %v534_v48 = vadd.f32 1.0, %v761_v47 }
 0x328   : > { %764 = vrcp.f32 %v534_v48 }
 0x32d   : > { %v763_v49 = vpop.eup %762 }
 0x32e   : > { %v539_v50 = vmul.f32 %v763_v49, %v525_v40 }
 0x330   : > { %v544_v51 = vrot.slane %v539_v50, %v945_v22 }
 0x332   : > { %v765_v52 = vpop.eup %764  ;;  %546 = vbcast.lane.b32.xlu1 %v544_v51, 256 }
 0x333   : > { %v540_v53 = vmul.f32 %v765_v52, %v526_v43 }
 0x335   : > { %v551_v54 = vrot.slane %v540_v53, %v945_v22 }
 0x337   : > { %553 = vbcast.lane.b32.xlu1 %v551_v54, 256 }
 0x3a4   : > { %v547_v56 = vpop.permute.xlu1 %546 }
 0x3a5   : > { %v555_v57 = vmul.f32 %v547_v56, %v490_v55 }
 0x3a7   : > { %v558_v58 = vsel %vm557_vm5, %v555_v57, 0.0 }
 0x3a8   : > { %v559_v59 = vrot.slane %v558_v58, 4 }
 0x3a9   : > { %v554_v60 = vpop.permute.xlu1 %553 }
 0x3aa   : > { %v556_v61 = vmul.f32 %v554_v60, %v490_v55  ;;  %v560_v62 = vadd.f32 %v559_v59, %v558_v58 }
 0x3ac   : > { %v565_v63 = vsel %vm557_vm5, %v556_v61, 0.0  ;;  %v561_v0 = vrot.slane %v560_v62, 2 }
 0x3ad   : > { %v566_v1 = vrot.slane %v565_v63, 4 }
 0x3ae   : > { %v562_v2 = vadd.f32 %v561_v0, %v560_v62 }
 0x3af   : > { %v567_v3 = vadd.f32 %v566_v1, %v565_v63 }
 0x3b0   : > { %v563_v4 = vrot.slane %v562_v2, 1 }
 0x3b1   : > { %v568_v22 = vrot.slane %v567_v3, 2 }
 0x3b2   : > { %v564_v6 = vadd.f32 %v563_v4, %v562_v2 }
 0x3b3   : > { %v569_v7 = vadd.f32 %v568_v22, %v567_v3 }
 0x3b4   : > { %v578_v8 = vadd.f32 %v679_v5, %v564_v6 }
 0x3b5   : > { %v570_v9 = vrot.slane %v569_v7, 1 }
 0x3b6   : > { %v680_v10 = vmul.f32 -1.442695, %v578_v8 }
 0x3b7   : > { %v571_v11 = vadd.f32 %v570_v9, %v569_v7 }
 0x3b8   : > { %766 = vpow2.f32 %v680_v10 }
 0x3b9   : > { %v579_v12 = vadd.f32 %v679_v5, %v571_v11 }
 0x3bb   : > { %v681_v13 = vmul.f32 -1.442695, %v579_v12 }
 0x3bd   : > { %768 = vpow2.f32 %v681_v13 }
 0x3c2   : > { %v767_v14 = vpop.eup %766 }
 0x3c3   : > { %v586_v15 = vadd.f32 1.0, %v767_v14 }
 0x3c5   : > { %770 = vrcp.f32 %v586_v15 }
 0x3c7   : > { %v769_v16 = vpop.eup %768 }
 0x3c8   : > { %v587_v17 = vadd.f32 1.0, %v769_v16 }
 0x3ca   : > { %772 = vrcp.f32 %v587_v17 }
 0x3cf   : > { %v771_v18 = vpop.eup %770 }
 0x3d0   : > { %593 = vst.msk [vmem:[#allocation7] sm:$0x1] %vm592_vm6, %v771_v18 }
 0x3d4   : > { %v773_v19 = vpop.eup %772 }
 0x3d5   : > { %594 = vst.msk [vmem:[#allocation7 + $0x1] sm:$0x1] %vm592_vm6, %v773_v19 }
 0x3d6 PF: > { %p973_p11 = scmp.eq.s32.totalorder %s665_s2, 1  ;;  %s848_s15 = smov [#allocation7]  }
 0x3d7   : > { %s604_s16 = sshll.u32 %s848_s15, 4  ;;  %s605_s16 = int_to_ptr.vmem [resolvable:$true] %s604_s16 }
 0x3d8   : > { %s774_s17 = scalar_lea.vmem %s605_s16, 32  ;;  %p781_p1 = scmp.lt.s32.totalorder %s605_s16, %s605_s16 }
 0x3d9   : > { %p775_p12 = scmp.ne.s32.totalorder %s605_s16, %s774_s17  ;;  %p782_p2 = scmp.lt.s32.totalorder %s774_s17, %s774_s17 }
 0x3db   : > { %p776_p13 = pnand %p775_p12, %p973_p11  ;;  %p783_p3 = por %p782_p2, %p781_p1 }
 0x3dd   : > { %p777_p0 = pneg %p776_p13 }
 0x3df   : > { %p784_p4 = pnand %p783_p3, %p777_p0 }
 0x3e1   : > { %787 = shalt.err (!%p784_p4)
}
 0x3e2   : > { %s788_s2 = scalar_lea.hbm %s1021_s7, 32 }
 0x3e3   : > { %p789_p5 = scmp.ne.s32.totalorder %s1021_s7, %s788_s2  ;;  %p794_p8 = scmp.lt.u32.totalorder %s788_s2, %s1021_s7 }
 0x3e5   : > { %p790_p6 = pnand %p789_p5, %p973_p11 }
 0x3e7   : > { %p791_p7 = pneg %p790_p6 }
 0x3e9   : > { %p796_p9 = pnand %p794_p8, %p791_p7 }
 0x3eb   : > { %799 = shalt.err (!%p796_p9)
}
 0x3ec   : > { %s849_s24 = smov 16   ;;  %s850_s25 = smov 1  }
 0x3ed   : > { %691 = dma.vmem_to_hbm [thread:$0]  (%p973_p11), %s605_s16, 32, %s1021_s7, [#allocation8], %s849_s24, %s849_s24, %s850_s25  }
 0x3ee   : > { %821 = dma.done.wait (%p973_p11), [#allocation8], 32  }
 0x3ef   : > { %823 = vsyncadd (%p973_p11), [#allocation8], 4294967264 }
 0x3f0 PF: > { %s20_s30 = sadd.s32 1, %s842_s30   ;;  %s1023_s26 = smov %s830_s27 }
 0x3f1   : > { %p17_p10 = scmp.ge.s32.totalorder %s20_s30, 4   ;;  %s1024_s27 = smov %s930_s11 }
 0x3f2   : > { %s1025_s28 = smov %s838_s29  ;;  %s1026_s29 = smov %s1028_s8 }
 0x3f3   :  { %19 = sbr.rel (!%p17_p10) target bundleno = 6 (0x6), region = 130 }
 0x3fa   :  { %620 = vsyncpa [#allocation8], 1 }
 0x3fb   :  { %622 = vsyncpa [#allocation8 + $0x1], 1 }

</bundles_post_ra>
